<compile_context>
chip_gen: v6e
topology: v6e:2x2x1
jax: 0.10.0
libtpu: 0.0.40
codegen_flags: <defaults>
</compile_context>

<pallas_src>
import jax
import jax.numpy as jnp
from jax.experimental import pallas as pl
from jax.experimental.pallas import tpu as pltpu

IN_F = 3      # fc1 in_features
HID = 4       # fc1 out_features == fc2 in/out features (gating width)
SUB = 8       # f32 sublane count; x^T rows padded 3 -> 8


def _gated_mlp_kernel(w1_ref, b1_ref, w2_ref, b2_ref, xt_ref, ot_ref):
    # xt_ref: (8, tb) VMEM tile, rows 0..2 hold x^T, rows 3..7 are zero.
    # w*/b*: tiny SMEM arrays, read as scalars -> VPU broadcast FMAs (no MXU).
    x0 = xt_ref[0:1, :]
    x1 = xt_ref[1:2, :]
    x2 = xt_ref[2:3, :]

    # v1 = x @ W1 + b1  (one (1, tb) lane-vector per output feature)
    v1 = [x0 * w1_ref[0, j] + x1 * w1_ref[1, j] + x2 * w1_ref[2, j] + b1_ref[j]
          for j in range(HID)]

    # v2 = v1 @ W2 + b2 ; v3 = sigmoid(v2) ; v4 = v1 * v3
    v4 = []
    for j in range(HID):
        acc = v1[0] * w2_ref[0, j]
        for k in range(1, HID):
            acc = acc + v1[k] * w2_ref[k, j]
        v3_j = jax.nn.sigmoid(acc + b2_ref[j])            # EUP transcendental
        v4.append(v1[j] * v3_j)

    ot_ref[...] = jnp.concatenate(v4, axis=0)             # (4, tb), lane-dense


def gated_mlp(x, w1, b1, w2, b2, *, tb=512):
    """x: (B, 3); w1: (3, 4); b1: (4,); w2: (4, 4); b2: (4,). Returns (B, 4)."""
    B = x.shape[0]
    assert tb % 128 == 0, "lane (batch) tile must be a multiple of 128"
    bp = pl.cdiv(B, tb) * tb

    # Batch-on-lanes input (8, bp); padded rows/columns are zero.  Padded batch
    # columns yield bias-only junk in the output; they are sliced off below and
    # must never be consumed unsliced.
    x_t = jnp.zeros((SUB, bp), jnp.float32).at[:IN_F, :B].set(x.T)

    out_t = pl.pallas_call(
        _gated_mlp_kernel,
        out_shape=jax.ShapeDtypeStruct((HID, bp), jnp.float32),
        grid_spec=pltpu.PrefetchScalarGridSpec(
            num_scalar_prefetch=0,
            grid=(bp // tb,),
            in_specs=[
                pl.BlockSpec(memory_space=pltpu.MemorySpace.SMEM),  # w1 (3,4)
                pl.BlockSpec(memory_space=pltpu.MemorySpace.SMEM),  # b1 (4,)
                pl.BlockSpec(memory_space=pltpu.MemorySpace.SMEM),  # w2 (4,4)
                pl.BlockSpec(memory_space=pltpu.MemorySpace.SMEM),  # b2 (4,)
                pl.BlockSpec((SUB, tb), lambda i: (0, i)),          # x^T tile
            ],
            out_specs=pl.BlockSpec((HID, tb), lambda i: (0, i)),    # v4^T tile
        ),
        compiler_params=pltpu.CompilerParams(
            dimension_semantics=("parallel",)),
    )(w1, b1, w2, b2, x_t)

    return out_t[:, :B].T                                           # (B, 4)


def _init_linear(key, fan_in, fan_out):
    # Deterministic init mimicking torch.nn.Linear default:
    # U(-1/sqrt(fan_in), +1/sqrt(fan_in)); weight stored as (in, out).
    kw, kb = jax.random.split(key)
    bound = 1.0 / jnp.sqrt(jnp.float32(fan_in))
    w = jax.random.uniform(kw, (fan_in, fan_out), jnp.float32, -bound, bound)
    b = jax.random.uniform(kb, (fan_out,), jnp.float32, -bound, bound)
    return w, b


def reference(x, w1, b1, w2, b2):
    v1 = x @ w1 + b1
    v2 = v1 @ w2 + b2
    v3 = jax.nn.sigmoid(v2)
    return v1 * v3


if __name__ == "__main__":
    key = jax.random.PRNGKey(0)
    kx, k1, k2 = jax.random.split(key, 3)

    B = 256                                               # batched (B, 3) input
    x1 = jax.random.normal(kx, (B, IN_F), jnp.float32)
    w1, b1 = _init_linear(k1, IN_F, HID)                  # fc1: 3 -> 4
    w2, b2 = _init_linear(k2, HID, HID)                   # fc2: 4 -> 4 (see note)

    # tb=128 -> 2 grid steps for B=256 (keeps both v7x TensorCores busy).
    out = gated_mlp(x1, w1, b1, w2, b2, tb=128)
    out = jax.block_until_ready(out)

    ref = reference(x1, w1, b1, w2, b2)
    assert out.shape == (B, HID)
    assert jnp.allclose(out, ref, atol=1e-5, rtol=1e-5), "mismatch vs JAX reference"

    print("KERNEL_OK")
</pallas_src>

<mosaic_0001>
module attributes {stable_mosaic.version = 11 : i64} {
  func.func @_gated_mlp_kernel(%arg0: i32, %arg1: memref<3x4xf32, #tpu.memory_space<smem>>, %arg2: memref<4xf32, #tpu.memory_space<smem>>, %arg3: memref<4x4xf32, #tpu.memory_space<smem>>, %arg4: memref<4xf32, #tpu.memory_space<smem>>, %arg5: memref<8x128xf32, #tpu.memory_space<vmem>>, %arg6: memref<4x128xf32, #tpu.memory_space<vmem>>) attributes {dimension_semantics = [#tpu.dimension_semantics<parallel>], iteration_bounds = array<i64: 2>, scalar_prefetch = 0 : i64, scratch_operands = 0 : i64, tpu.core_type = #tpu.core_type<tc>, window_params = [{transform_indices = @transform_0, window_bounds = array<i64: 3, 4>}, {transform_indices = @transform_1, window_bounds = array<i64: 4>}, {transform_indices = @transform_2, window_bounds = array<i64: 4, 4>}, {transform_indices = @transform_3, window_bounds = array<i64: 4>}, {transform_indices = @transform_4, window_bounds = array<i64: 8, 128>}, {transform_indices = @transform_5, window_bounds = array<i64: 4, 128>}]} {
    %c0 = arith.constant 0 : index
    %c0_0 = arith.constant 0 : index
    %0 = vector.load %arg5[%c0, %c0_0] : memref<8x128xf32, #tpu.memory_space<vmem>>, vector<1x128xf32>
    %c1 = arith.constant 1 : index
    %c0_1 = arith.constant 0 : index
    %1 = vector.load %arg5[%c1, %c0_1] : memref<8x128xf32, #tpu.memory_space<vmem>>, vector<1x128xf32>
    %c2 = arith.constant 2 : index
    %c0_2 = arith.constant 0 : index
    %2 = vector.load %arg5[%c2, %c0_2] : memref<8x128xf32, #tpu.memory_space<vmem>>, vector<1x128xf32>
    %c0_3 = arith.constant 0 : index
    %c0_4 = arith.constant 0 : index
    %3 = memref.load %arg1[%c0_3, %c0_4] : memref<3x4xf32, #tpu.memory_space<smem>>
    %4 = vector.broadcast %3 : f32 to vector<1x128xf32>
    %5 = arith.mulf %0, %4 : vector<1x128xf32>
    %c1_5 = arith.constant 1 : index
    %c0_6 = arith.constant 0 : index
    %6 = memref.load %arg1[%c1_5, %c0_6] : memref<3x4xf32, #tpu.memory_space<smem>>
    %7 = vector.broadcast %6 : f32 to vector<1x128xf32>
    %8 = arith.mulf %1, %7 : vector<1x128xf32>
    %9 = arith.addf %5, %8 : vector<1x128xf32>
    %c2_7 = arith.constant 2 : index
    %c0_8 = arith.constant 0 : index
    %10 = memref.load %arg1[%c2_7, %c0_8] : memref<3x4xf32, #tpu.memory_space<smem>>
    %11 = vector.broadcast %10 : f32 to vector<1x128xf32>
    %12 = arith.mulf %2, %11 : vector<1x128xf32>
    %13 = arith.addf %9, %12 : vector<1x128xf32>
    %c0_9 = arith.constant 0 : index
    %14 = memref.load %arg2[%c0_9] : memref<4xf32, #tpu.memory_space<smem>>
    %15 = vector.broadcast %14 : f32 to vector<1x128xf32>
    %16 = arith.addf %13, %15 : vector<1x128xf32>
    %c0_10 = arith.constant 0 : index
    %c1_11 = arith.constant 1 : index
    %17 = memref.load %arg1[%c0_10, %c1_11] : memref<3x4xf32, #tpu.memory_space<smem>>
    %18 = vector.broadcast %17 : f32 to vector<1x128xf32>
    %19 = arith.mulf %0, %18 : vector<1x128xf32>
    %c1_12 = arith.constant 1 : index
    %c1_13 = arith.constant 1 : index
    %20 = memref.load %arg1[%c1_12, %c1_13] : memref<3x4xf32, #tpu.memory_space<smem>>
    %21 = vector.broadcast %20 : f32 to vector<1x128xf32>
    %22 = arith.mulf %1, %21 : vector<1x128xf32>
    %23 = arith.addf %19, %22 : vector<1x128xf32>
    %c2_14 = arith.constant 2 : index
    %c1_15 = arith.constant 1 : index
    %24 = memref.load %arg1[%c2_14, %c1_15] : memref<3x4xf32, #tpu.memory_space<smem>>
    %25 = vector.broadcast %24 : f32 to vector<1x128xf32>
    %26 = arith.mulf %2, %25 : vector<1x128xf32>
    %27 = arith.addf %23, %26 : vector<1x128xf32>
    %c1_16 = arith.constant 1 : index
    %28 = memref.load %arg2[%c1_16] : memref<4xf32, #tpu.memory_space<smem>>
    %29 = vector.broadcast %28 : f32 to vector<1x128xf32>
    %30 = arith.addf %27, %29 : vector<1x128xf32>
    %c0_17 = arith.constant 0 : index
    %c2_18 = arith.constant 2 : index
    %31 = memref.load %arg1[%c0_17, %c2_18] : memref<3x4xf32, #tpu.memory_space<smem>>
    %32 = vector.broadcast %31 : f32 to vector<1x128xf32>
    %33 = arith.mulf %0, %32 : vector<1x128xf32>
    %c1_19 = arith.constant 1 : index
    %c2_20 = arith.constant 2 : index
    %34 = memref.load %arg1[%c1_19, %c2_20] : memref<3x4xf32, #tpu.memory_space<smem>>
    %35 = vector.broadcast %34 : f32 to vector<1x128xf32>
    %36 = arith.mulf %1, %35 : vector<1x128xf32>
    %37 = arith.addf %33, %36 : vector<1x128xf32>
    %c2_21 = arith.constant 2 : index
    %c2_22 = arith.constant 2 : index
    %38 = memref.load %arg1[%c2_21, %c2_22] : memref<3x4xf32, #tpu.memory_space<smem>>
    %39 = vector.broadcast %38 : f32 to vector<1x128xf32>
    %40 = arith.mulf %2, %39 : vector<1x128xf32>
    %41 = arith.addf %37, %40 : vector<1x128xf32>
    %c2_23 = arith.constant 2 : index
    %42 = memref.load %arg2[%c2_23] : memref<4xf32, #tpu.memory_space<smem>>
    %43 = vector.broadcast %42 : f32 to vector<1x128xf32>
    %44 = arith.addf %41, %43 : vector<1x128xf32>
    %c0_24 = arith.constant 0 : index
    %c3 = arith.constant 3 : index
    %45 = memref.load %arg1[%c0_24, %c3] : memref<3x4xf32, #tpu.memory_space<smem>>
    %46 = vector.broadcast %45 : f32 to vector<1x128xf32>
    %47 = arith.mulf %0, %46 : vector<1x128xf32>
    %c1_25 = arith.constant 1 : index
    %c3_26 = arith.constant 3 : index
    %48 = memref.load %arg1[%c1_25, %c3_26] : memref<3x4xf32, #tpu.memory_space<smem>>
    %49 = vector.broadcast %48 : f32 to vector<1x128xf32>
    %50 = arith.mulf %1, %49 : vector<1x128xf32>
    %51 = arith.addf %47, %50 : vector<1x128xf32>
    %c2_27 = arith.constant 2 : index
    %c3_28 = arith.constant 3 : index
    %52 = memref.load %arg1[%c2_27, %c3_28] : memref<3x4xf32, #tpu.memory_space<smem>>
    %53 = vector.broadcast %52 : f32 to vector<1x128xf32>
    %54 = arith.mulf %2, %53 : vector<1x128xf32>
    %55 = arith.addf %51, %54 : vector<1x128xf32>
    %c3_29 = arith.constant 3 : index
    %56 = memref.load %arg2[%c3_29] : memref<4xf32, #tpu.memory_space<smem>>
    %57 = vector.broadcast %56 : f32 to vector<1x128xf32>
    %58 = arith.addf %55, %57 : vector<1x128xf32>
    %c0_30 = arith.constant 0 : index
    %c0_31 = arith.constant 0 : index
    %59 = memref.load %arg3[%c0_30, %c0_31] : memref<4x4xf32, #tpu.memory_space<smem>>
    %60 = vector.broadcast %59 : f32 to vector<1x128xf32>
    %61 = arith.mulf %16, %60 : vector<1x128xf32>
    %c1_32 = arith.constant 1 : index
    %c0_33 = arith.constant 0 : index
    %62 = memref.load %arg3[%c1_32, %c0_33] : memref<4x4xf32, #tpu.memory_space<smem>>
    %63 = vector.broadcast %62 : f32 to vector<1x128xf32>
    %64 = arith.mulf %30, %63 : vector<1x128xf32>
    %65 = arith.addf %61, %64 : vector<1x128xf32>
    %c2_34 = arith.constant 2 : index
    %c0_35 = arith.constant 0 : index
    %66 = memref.load %arg3[%c2_34, %c0_35] : memref<4x4xf32, #tpu.memory_space<smem>>
    %67 = vector.broadcast %66 : f32 to vector<1x128xf32>
    %68 = arith.mulf %44, %67 : vector<1x128xf32>
    %69 = arith.addf %65, %68 : vector<1x128xf32>
    %c3_36 = arith.constant 3 : index
    %c0_37 = arith.constant 0 : index
    %70 = memref.load %arg3[%c3_36, %c0_37] : memref<4x4xf32, #tpu.memory_space<smem>>
    %71 = vector.broadcast %70 : f32 to vector<1x128xf32>
    %72 = arith.mulf %58, %71 : vector<1x128xf32>
    %73 = arith.addf %69, %72 : vector<1x128xf32>
    %c0_38 = arith.constant 0 : index
    %74 = memref.load %arg4[%c0_38] : memref<4xf32, #tpu.memory_space<smem>>
    %75 = vector.broadcast %74 : f32 to vector<1x128xf32>
    %76 = arith.addf %73, %75 : vector<1x128xf32>
    %77 = arith.negf %76 : vector<1x128xf32>
    %78 = math.exp %77 : vector<1x128xf32>
    %cst = arith.constant 1.000000e+00 : f32
    %79 = vector.broadcast %cst : f32 to vector<1x128xf32>
    %80 = arith.addf %79, %78 : vector<1x128xf32>
    %81 = arith.divf %79, %80 : vector<1x128xf32>
    %82 = arith.mulf %16, %81 : vector<1x128xf32>
    %c0_39 = arith.constant 0 : index
    %c1_40 = arith.constant 1 : index
    %83 = memref.load %arg3[%c0_39, %c1_40] : memref<4x4xf32, #tpu.memory_space<smem>>
    %84 = vector.broadcast %83 : f32 to vector<1x128xf32>
    %85 = arith.mulf %16, %84 : vector<1x128xf32>
    %c1_41 = arith.constant 1 : index
    %c1_42 = arith.constant 1 : index
    %86 = memref.load %arg3[%c1_41, %c1_42] : memref<4x4xf32, #tpu.memory_space<smem>>
    %87 = vector.broadcast %86 : f32 to vector<1x128xf32>
    %88 = arith.mulf %30, %87 : vector<1x128xf32>
    %89 = arith.addf %85, %88 : vector<1x128xf32>
    %c2_43 = arith.constant 2 : index
    %c1_44 = arith.constant 1 : index
    %90 = memref.load %arg3[%c2_43, %c1_44] : memref<4x4xf32, #tpu.memory_space<smem>>
    %91 = vector.broadcast %90 : f32 to vector<1x128xf32>
    %92 = arith.mulf %44, %91 : vector<1x128xf32>
    %93 = arith.addf %89, %92 : vector<1x128xf32>
    %c3_45 = arith.constant 3 : index
    %c1_46 = arith.constant 1 : index
    %94 = memref.load %arg3[%c3_45, %c1_46] : memref<4x4xf32, #tpu.memory_space<smem>>
    %95 = vector.broadcast %94 : f32 to vector<1x128xf32>
    %96 = arith.mulf %58, %95 : vector<1x128xf32>
    %97 = arith.addf %93, %96 : vector<1x128xf32>
    %c1_47 = arith.constant 1 : index
    %98 = memref.load %arg4[%c1_47] : memref<4xf32, #tpu.memory_space<smem>>
    %99 = vector.broadcast %98 : f32 to vector<1x128xf32>
    %100 = arith.addf %97, %99 : vector<1x128xf32>
    %101 = arith.negf %100 : vector<1x128xf32>
    %102 = math.exp %101 : vector<1x128xf32>
    %cst_48 = arith.constant 1.000000e+00 : f32
    %103 = vector.broadcast %cst_48 : f32 to vector<1x128xf32>
    %104 = arith.addf %103, %102 : vector<1x128xf32>
    %105 = arith.divf %103, %104 : vector<1x128xf32>
    %106 = arith.mulf %30, %105 : vector<1x128xf32>
    %c0_49 = arith.constant 0 : index
    %c2_50 = arith.constant 2 : index
    %107 = memref.load %arg3[%c0_49, %c2_50] : memref<4x4xf32, #tpu.memory_space<smem>>
    %108 = vector.broadcast %107 : f32 to vector<1x128xf32>
    %109 = arith.mulf %16, %108 : vector<1x128xf32>
    %c1_51 = arith.constant 1 : index
    %c2_52 = arith.constant 2 : index
    %110 = memref.load %arg3[%c1_51, %c2_52] : memref<4x4xf32, #tpu.memory_space<smem>>
    %111 = vector.broadcast %110 : f32 to vector<1x128xf32>
    %112 = arith.mulf %30, %111 : vector<1x128xf32>
    %113 = arith.addf %109, %112 : vector<1x128xf32>
    %c2_53 = arith.constant 2 : index
    %c2_54 = arith.constant 2 : index
    %114 = memref.load %arg3[%c2_53, %c2_54] : memref<4x4xf32, #tpu.memory_space<smem>>
    %115 = vector.broadcast %114 : f32 to vector<1x128xf32>
    %116 = arith.mulf %44, %115 : vector<1x128xf32>
    %117 = arith.addf %113, %116 : vector<1x128xf32>
    %c3_55 = arith.constant 3 : index
    %c2_56 = arith.constant 2 : index
    %118 = memref.load %arg3[%c3_55, %c2_56] : memref<4x4xf32, #tpu.memory_space<smem>>
    %119 = vector.broadcast %118 : f32 to vector<1x128xf32>
    %120 = arith.mulf %58, %119 : vector<1x128xf32>
    %121 = arith.addf %117, %120 : vector<1x128xf32>
    %c2_57 = arith.constant 2 : index
    %122 = memref.load %arg4[%c2_57] : memref<4xf32, #tpu.memory_space<smem>>
    %123 = vector.broadcast %122 : f32 to vector<1x128xf32>
    %124 = arith.addf %121, %123 : vector<1x128xf32>
    %125 = arith.negf %124 : vector<1x128xf32>
    %126 = math.exp %125 : vector<1x128xf32>
    %cst_58 = arith.constant 1.000000e+00 : f32
    %127 = vector.broadcast %cst_58 : f32 to vector<1x128xf32>
    %128 = arith.addf %127, %126 : vector<1x128xf32>
    %129 = arith.divf %127, %128 : vector<1x128xf32>
    %130 = arith.mulf %44, %129 : vector<1x128xf32>
    %c0_59 = arith.constant 0 : index
    %c3_60 = arith.constant 3 : index
    %131 = memref.load %arg3[%c0_59, %c3_60] : memref<4x4xf32, #tpu.memory_space<smem>>
    %132 = vector.broadcast %131 : f32 to vector<1x128xf32>
    %133 = arith.mulf %16, %132 : vector<1x128xf32>
    %c1_61 = arith.constant 1 : index
    %c3_62 = arith.constant 3 : index
    %134 = memref.load %arg3[%c1_61, %c3_62] : memref<4x4xf32, #tpu.memory_space<smem>>
    %135 = vector.broadcast %134 : f32 to vector<1x128xf32>
    %136 = arith.mulf %30, %135 : vector<1x128xf32>
    %137 = arith.addf %133, %136 : vector<1x128xf32>
    %c2_63 = arith.constant 2 : index
    %c3_64 = arith.constant 3 : index
    %138 = memref.load %arg3[%c2_63, %c3_64] : memref<4x4xf32, #tpu.memory_space<smem>>
    %139 = vector.broadcast %138 : f32 to vector<1x128xf32>
    %140 = arith.mulf %44, %139 : vector<1x128xf32>
    %141 = arith.addf %137, %140 : vector<1x128xf32>
    %c3_65 = arith.constant 3 : index
    %c3_66 = arith.constant 3 : index
    %142 = memref.load %arg3[%c3_65, %c3_66] : memref<4x4xf32, #tpu.memory_space<smem>>
    %143 = vector.broadcast %142 : f32 to vector<1x128xf32>
    %144 = arith.mulf %58, %143 : vector<1x128xf32>
    %145 = arith.addf %141, %144 : vector<1x128xf32>
    %c3_67 = arith.constant 3 : index
    %146 = memref.load %arg4[%c3_67] : memref<4xf32, #tpu.memory_space<smem>>
    %147 = vector.broadcast %146 : f32 to vector<1x128xf32>
    %148 = arith.addf %145, %147 : vector<1x128xf32>
    %149 = arith.negf %148 : vector<1x128xf32>
    %150 = math.exp %149 : vector<1x128xf32>
    %cst_68 = arith.constant 1.000000e+00 : f32
    %151 = vector.broadcast %cst_68 : f32 to vector<1x128xf32>
    %152 = arith.addf %151, %150 : vector<1x128xf32>
    %153 = arith.divf %151, %152 : vector<1x128xf32>
    %154 = arith.mulf %58, %153 : vector<1x128xf32>
    %155 = tpu.concatenate %82, %106, %130, %154 in 0 : vector<1x128xf32>, vector<1x128xf32>, vector<1x128xf32>, vector<1x128xf32> -> vector<4x128xf32>
    %c0_69 = arith.constant 0 : index
    %c0_70 = arith.constant 0 : index
    %156 = vector.load %arg6[%c0_69, %c0_70] : memref<4x128xf32, #tpu.memory_space<vmem>>, vector<4x128xf32>
    tpu.vector_store %arg6[%c0_69, %c0_70], %155 {strides = array<i32>} : memref<4x128xf32, #tpu.memory_space<vmem>>, vector<4x128xf32>,
    return
  }
  func.func @transform_0(%arg0: i32) -> (i32, i32) {
    %c0_i32 = arith.constant 0 : i32
    %c0_i32_0 = arith.constant 0 : i32
    %c0_i32_1 = arith.constant 0 : i32
    return %c0_i32, %c0_i32_0 : i32, i32
  }
  func.func @transform_1(%arg0: i32) -> i32 {
    %c0_i32 = arith.constant 0 : i32
    %c0_i32_0 = arith.constant 0 : i32
    return %c0_i32 : i32
  }
  func.func @transform_2(%arg0: i32) -> (i32, i32) {
    %c0_i32 = arith.constant 0 : i32
    %c0_i32_0 = arith.constant 0 : i32
    %c0_i32_1 = arith.constant 0 : i32
    return %c0_i32, %c0_i32_0 : i32, i32
  }
  func.func @transform_3(%arg0: i32) -> i32 {
    %c0_i32 = arith.constant 0 : i32
    %c0_i32_0 = arith.constant 0 : i32
    return %c0_i32 : i32
  }
  func.func @transform_4(%arg0: i32) -> (i32, i32) {
    %c0_i32 = arith.constant 0 : i32
    %c0_i32_0 = arith.constant 0 : i32
    return %c0_i32, %arg0 : i32, i32
  }
  func.func @transform_5(%arg0: i32) -> (i32, i32) {
    %c0_i32 = arith.constant 0 : i32
    %c0_i32_0 = arith.constant 0 : i32
    return %c0_i32, %arg0 : i32, i32
  }
}

</mosaic_0001>

<bundles_post_ra>
// kernel: tpu_custom_call.1
= control target key start
LH: loop header
LB: loop body
LE: loop exit
PB: predicated region body
PF: predicated region fallthrough
CT: control target
= control target key end

     0   :  { %10 = vsyncpa [#allocation5], 0  ;;  %s1199_s0 = inlined_call_operand.hbm [shape: f32[3,4], index: 0, kind: input, shape index: {}]   ;;  %s1200_s1 = inlined_call_operand.vmem [shape: f32[4], index: 1, kind: input, shape index: {}]   ;;  %s1201_s2 = inlined_call_operand.hbm [shape: f32[4,4], index: 2, kind: input, shape index: {}]   ;;  %s1202_s3 = inlined_call_operand.vmem [shape: f32[4], index: 3, kind: input, shape index: {}]   ;;  %s1203_s4 = inlined_call_operand.hbm [shape: f32[8,256], index: 4, kind: input, shape index: {}]   ;;  %s1204_s5 = inlined_call_operand.hbm [shape: f32[4,256], index: 5, kind: output, shape index: {}]  }
   0x1   :  { %11 = vsyncpa [#allocation6], 0 }
   0x2   :  { %12 = vsyncpa [#allocation9], 0 }
   0x3   :  { %13 = vsyncpa [#allocation11], 0 }
   0x4   :  { %14 = vsyncpa [#allocation3], 0 }
   0x5   :  { %16 = vsyncpa [#allocation3 + $0x1], 0 }
   0x6   :  { %17 = vsyncpa [#allocation4], 0 }
   0x7   :  { %19 = vsyncpa [#allocation4 + $0x1], 0  ;;  %s949_s18 = smov 0   ;;  %s951_s19 = smov 0  }
   0x8   :  { %s953_s20 = smov 0   ;;  %s955_s21 = smov 0  }
   0x9 LB: > { %s188_s24 = sshll.u32 %s1200_s1, 4  ;;  %s973_s25 = sadd.s32 4294967295, %s911_s21   ;;  %s911_s21 = sphi %s955_s21, %s1232_s21   ;;  %s907_s20 = sphi %s953_s20, %s1231_s20   ;;  %s903_s19 = sphi %s951_s19, %s1230_s19   ;;  %s899_s18 = sphi %s949_s18, %s1229_s18   ;;  %s189_s24 = int_to_ptr.vmem [resolvable:$true] %s188_s24 }
   0xa   : > { %p593_p0 = scmp.ge.s32.totalorder %s911_s21, 1  ;;  %p1205_p1 = scmp.eq.s32.totalorder %s973_s25, 0 }
   0xb   : > { %p166_p2 = scmp.lt.s32.totalorder %s911_s21, 3  ;;  %s208_s29 = sshll.u32 %s1202_s3, 4  ;;  %s209_s29 = int_to_ptr.vmem [resolvable:$true] %s208_s29 }
   0xc   : > { %s913_s6 = smov [#allocation2]   ;;  %s762_s9 = scalar_lea.vmem %s189_s24, 16 }
   0xd   : > { %p979_p4 = pnand %p593_p0, %p166_p2  ;;  %p763_p7 = scmp.ne.s32.totalorder %s189_s24, %s762_s9 }
   0xe   : > { %p770_p11 = scmp.lt.s32.totalorder %s189_s24, %s189_s24  ;;  %p771_p12 = scmp.lt.s32.totalorder %s762_s9, %s762_s9 }
   0xf   : > { %s1209_s26 = scalar_select %p979_p4, 1, 0 }
  0x10   : > { %p668_p5 = pneg %p979_p4  ;;  %p772_p13 = por %p771_p12, %p770_p11 }
  0x12   : > { %p990_p6 = pnand %p668_p5, %p1205_p1 }
  0x14   : > { %671 = dma.hbm_to_smem (!%p990_p6), %s1199_s0, 64, %s913_s6, [#allocation5]  }
  0x15   : > { %p764_p8 = pneg %p990_p6 }
  0x17   : > { %p765_p9 = pnand %p764_p8, %p763_p7 }
  0x19   : > { %p766_p10 = pneg %p765_p9 }
  0x1b   : > { %p773_p0 = pnand %p772_p13, %p766_p10 }
  0x1d   : > { %776 = shalt.err (!%p773_p0)
}
  0x1e   : > { %s914_s10 = smov [#allocation7]   ;;  %s915_s11 = smov [#allocation8]  }
  0x1f   : > { %674 = dma.vmem_to_smem (!%p990_p6), %s189_s24, 16, %s914_s10, [#allocation6]  }
  0x20   : > { %677 = dma.hbm_to_smem (!%p990_p6), %s1201_s2, 64, %s915_s11, [#allocation9]  }
  0x21   : > { %s788_s14 = scalar_lea.vmem %s209_s29, 16  ;;  %p796_p9 = scmp.lt.s32.totalorder %s209_s29, %s209_s29 }
  0x22   : > { %p789_p2 = scmp.ne.s32.totalorder %s209_s29, %s788_s14  ;;  %p797_p10 = scmp.lt.s32.totalorder %s788_s14, %s788_s14 }
  0x24   : > { %p791_p5 = pnand %p789_p2, %p764_p8  ;;  %p798_p11 = por %p797_p10, %p796_p9 }
  0x26   : > { %p792_p7 = pneg %p791_p5 }
  0x28   : > { %p799_p12 = pnand %p798_p11, %p792_p7 }
  0x2a   : > { %802 = shalt.err (!%p799_p12)
}
  0x2b   : > { %s916_s15 = smov [#allocation10]   ;;  %s592_s16 = sadd.s32 4294967294, %s911_s21  }
  0x2c   : > { %680 = dma.vmem_to_smem (!%p990_p6), %s209_s29, 16, %s916_s15, [#allocation11]  }
  0x2d   : > { %s1018_s17 = sadd.s32 1, %s911_s21   ;;  %s116_s23 = sadd.s32 1, %s907_s20 }
  0x2e   : > { %s113_s22 = ssub.s32 %s911_s21, %s1018_s17  ;;  %p123_p13 = scmp.ne.s32.totalorder %s907_s20, %s903_s19 }
  0x2f   : > { %p114_p8 = scmp.eq.s32.totalorder %s113_s22, 0  ;;  %p124_p0 = scmp.eq.s32.totalorder %s911_s21, 0 }
  0x30   : > { %p129_p2 = scmp.ne.s32.totalorder %s903_s19, %s899_s18  ;;  %p153_p7 = scmp.eq.s32.totalorder %s973_s25, 1 }
  0x31   : > { %s1029_s24 = scalar_select %p114_p8, %s907_s20, %s116_s23  }
  0x32   : > { %p1031_p5 = por %p124_p0, %p123_p13  ;;  %p1037_p6 = por %p1205_p1, %p129_p2 }
  0x33   : > { %p159_p9 = scmp.eq.s32.totalorder %s592_s16, 1  ;;  %p693_p10 = scmp.lt.s32.totalorder %s911_s21, 2 }
  0x34   : > { %s1212_s28 = scalar_select %p1037_p6, 1, 0 }
  0x35   : > { %s219_s29 = sand.u32 1, %s907_s20   ;;  %p1044_p11 = por %p153_p7, %p123_p13 }
  0x36   : > { %p1048_p12 = por %p159_p9, %p129_p2  ;;  %s599_s7 = sshll.u32 %s219_s29, 3 }
  0x37   : > { %s1213_s30 = scalar_select %p1044_p11, 1, 0 }
  0x38   : > { %s1214_s6 = scalar_select %p1048_p12, 1, 0 }
  0x39   : > { %s600_s8 = sshll.u32 %s911_s21, 7  ;;  %s223_s12 = scalar_lea.vmem [#allocation12], %s599_s7 }
  0x3a   : > { %s1056_s11 = scalar_lea.hbm %s1203_s4, %s600_s8  ;;  %s230_s13 = sshll.u32 %s223_s12, 4  ;;  %s231_s13 = int_to_ptr.vmem [resolvable:$true] %s230_s13 }
  0x3b   : > { %p1060_p8 = pnand %p693_p10, %p1031_p5  ;;  %s220_s15 = scalar_lea.sflag [#allocation3], %s219_s29 }
  0x3c   : > { %s803_s16 = scalar_lea.hbm %s1056_s11, 128  ;;  %s808_s8 = scalar_lea.hbm %s1203_s4, 256 }
  0x3d   : > { %p804_p13 = scmp.ne.s32.totalorder %s1056_s11, %s803_s16  ;;  %p805_p0 = pneg %p1060_p8 }
  0x3e   : > { %p809_p9 = scmp.lt.s32.totalorder %s1056_s11, %s1203_s4  ;;  %p810_p5 = scmp.lt.s32.totalorder %s808_s8, %s803_s16 }
  0x3f   : > { %p806_p2 = pnand %p805_p0, %p804_p13 }
  0x40   : > { %p811_p10 = por %p810_p5, %p809_p9 }
  0x41   : > { %p807_p7 = pneg %p806_p2 }
  0x43   : > { %p812_p3 = pnand %p811_p10, %p807_p7 }
  0x45   : > { %815 = shalt.err (!%p812_p3)
}
  0x46   : > { %s816_s27 = scalar_lea.vmem %s231_s13, 128  ;;  %s917_s29 = smov [#allocation12]  }
  0x47   : > { %p817_p1 = scmp.ne.s32.totalorder %s231_s13, %s816_s27  ;;  %s821_s10 = sshll.u32 %s917_s29, 4  ;;  %s822_s10 = int_to_ptr.vmem [resolvable:$false] %s821_s10 }
  0x48   : > { %s823_s12 = scalar_lea.vmem %s822_s10, 256  ;;  %p824_p13 = scmp.lt.s32.totalorder %s231_s13, %s822_s10 }
  0x49   : > { %p819_p12 = pnand %p817_p1, %p805_p0  ;;  %p825_p2 = scmp.lt.s32.totalorder %s823_s12, %s816_s27 }
  0x4b   : > { %p820_p11 = pneg %p819_p12  ;;  %p826_p6 = por %p825_p2, %p824_p13 }
  0x4d   : > { %p827_p4 = pnand %p826_p6, %p820_p11 }
  0x4f   : > { %830 = shalt.err (!%p827_p4)
}
  0x50   : > { %684 = dma.hbm_to_vmem [thread:$0]  (!%p1060_p8), %s1056_s11, 128, %s231_s13, %s220_s15  }
  0x51   : > { %p1216_p7 = scmp.ne.s32.totalorder %s1209_s26, 0 }
  0x52   : > { %p1217_p3 = scmp.eq.s32.totalorder (!%p1216_p7), %s973_s25, 0 }
  0x53   : > { %239 = sbr.rel (%p1216_p7) target bundleno = 204 (0xcc), region = 40 }
  0x58   : > { %874 = dma.done.wait (%p1217_p3), [#allocation5], 64   ;;  %p1218_p1 = pmov %p1217_p3 }
  0x5a   : > { %876 = vsyncadd (%p1218_p1), [#allocation5], 4294967232  ;;  %p1219_p12 = pmov %p1218_p1 }
  0x5b   : > { %p1220_p0 = pmov %p1218_p1 }
  0x5c   : > { %878 = dma.done.wait (%p1219_p12), [#allocation6], 16  }
  0x5d   : > { %880 = vsyncadd (%p1220_p0), [#allocation6], 4294967280  ;;  %p1221_p4 = pmov %p1220_p0 }
  0x5e   : > { %p1222_p6 = pmov %p1220_p0 }
  0x5f   : > { %882 = dma.done.wait (%p1221_p4), [#allocation9], 64  }
  0x60   : > { %884 = vsyncadd (%p1222_p6), [#allocation9], 4294967232  ;;  %p1223_p11 = pmov %p1220_p0 }
  0x61   : > { %p1224_p8 = pmov %p1220_p0 }
  0x62   : > { %886 = dma.done.wait (%p1223_p11), [#allocation11], 16  }
  0x63   : > { %888 = vsyncadd (%p1224_p8), [#allocation11], 4294967280  ;;  %s1097_s26 = sand.u32 1, %s903_s19   ;;  %p1225_p9 = scmp.ne.s32.totalorder %s1212_s28, 0 }
  0x64   : > { %s606_s11 = sshll.u32 %s1097_s26, 3  ;;  %s258_s13 = scalar_lea.sflag [#allocation3], %s1097_s26 }
  0x65   : > { %s261_s14 = scalar_lea.vmem [#allocation12], %s606_s11 }
  0x66   : > { %890 = dma.done.wait (%p1225_p9), %s258_s13, 128  }
  0x67   : > { %892 = vsyncadd (%p1225_p9), %s258_s13, 4294967168 }
  0x68   : > { %266 = sfence }
  0x69   : > { %s292_s15 = sld [smem:[#allocation2]]  ;;  %v289_v0 = vld [vmem:[%s261_s14] sm:$0x1]  ;;  %v290_v1 = vld [vmem:[%s261_s14 + $0x1] sm:$0x1]  ;;  %vm457_vm0 = vcmask 1040384  }
  0x6a   : > { %s608_s16 = sld [smem:[#allocation2 + $0x80]]  ;;  %v291_v6 = vld [vmem:[%s261_s14 + $0x2] sm:$0x1]  ;;  %vm459_vm1 = vcmask 1041408   ;;  %vm461_vm2 = vcmask 1042432   ;;  %p1226_p10 = scmp.ne.s32.totalorder %s1213_s30, 0 }
  0x6b   : > { %s609_s22 = sld [smem:[#allocation2 + $0x100]] }
  0x6c   : > { %s1105_s23 = sld [smem:[#allocation7]] }
  0x6d   : > { %s610_s8 = sld [smem:[#allocation2 + $0x1]] }
  0x6e   : > { %s611_s7 = sld [smem:[#allocation2 + $0x81]] }
  0x6f   : > { %v293_v2 = vstv %s292_s15  ;;  %s612_s9 = sld [smem:[#allocation2 + $0x101]] }
  0x70   : > { %v296_v3 = vstv %s608_s16  ;;  %s1107_s27 = sld [smem:[#allocation7 + $0x1]]  ;;  %v294_v4 = vmul.f32 %v293_v2, %v289_v0 }
  0x71   : > { %s614_s29 = sld [smem:[#allocation2 + $0x2]]  ;;  %v297_v5 = vmul.f32 %v296_v3, %v290_v1  ;;  %v300_v7 = vstv %s609_s22 }
  0x72   : > { %s615_s28 = sld [smem:[#allocation2 + $0x82]]  ;;  %v301_v14 = vmul.f32 %v300_v7, %v291_v6  ;;  %v304_v24 = vstv %s1105_s23 }
  0x73   : > { %v307_v8 = vstv %s610_s8  ;;  %s616_s10 = sld [smem:[#allocation2 + $0x102]]  ;;  %v298_v13 = vadd.f32 %v297_v5, %v294_v4 }
  0x74   : > { %v308_v9 = vmul.f32 %v307_v8, %v289_v0  ;;  %v310_v10 = vstv %s611_s7  ;;  %s1109_s12 = sld [smem:[#allocation7 + $0x2]] }
  0x75   : > { %v311_v11 = vmul.f32 %v310_v10, %v290_v1  ;;  %v314_v12 = vstv %s612_s9  ;;  %s618_s11 = sld [smem:[#allocation2 + $0x3]]  ;;  %v302_v22 = vadd.f32 %v301_v14, %v298_v13 }
  0x76   : > { %s619_s13 = sld [smem:[#allocation2 + $0x83]]  ;;  %v315_v16 = vmul.f32 %v314_v12, %v291_v6  ;;  %v318_v28 = vstv %s1107_s27 }
  0x77   : > { %v312_v15 = vadd.f32 %v311_v11, %v308_v9  ;;  %v321_v17 = vstv %s614_s29  ;;  %s620_s15 = sld [smem:[#allocation2 + $0x103]]  ;;  %v1120_v35 = vadd.f32 %v304_v24, %v302_v22 }
  0x78   : > { %v322_v18 = vmul.f32 %v321_v17, %v289_v0  ;;  %v324_v19 = vstv %s615_s28  ;;  %s1111_s14 = sld [smem:[#allocation7 + $0x3]] }
  0x79   : > { %v325_v20 = vmul.f32 %v324_v19, %v290_v1  ;;  %v328_v21 = vstv %s616_s10  ;;  %s348_s16 = sld [smem:[#allocation8]]  ;;  %v316_v25 = vadd.f32 %v315_v16, %v312_v15 }
  0x7a   : > { %v329_v23 = vmul.f32 %v328_v21, %v291_v6  ;;  %s622_s22 = sld [smem:[#allocation8 + $0x80]]  ;;  %v332_v32 = vstv %s1109_s12 }
  0x7b   : > { %v326_v26 = vadd.f32 %v325_v20, %v322_v18  ;;  %v335_v27 = vstv %s618_s11  ;;  %s623_s8 = sld [smem:[#allocation8 + $0x100]]  ;;  %v1122_v37 = vadd.f32 %v318_v28, %v316_v25 }
  0x7c   : > { %v336_v29 = vmul.f32 %v335_v27, %v289_v0  ;;  %v338_v30 = vstv %s619_s13  ;;  %s1115_s7 = sld [smem:[#allocation8 + $0x180]] }
  0x7d   : > { %v330_v31 = vadd.f32 %v329_v23, %v326_v26  ;;  %v339_v33 = vmul.f32 %v338_v30, %v290_v1  ;;  %v342_v34 = vstv %s620_s15  ;;  %s1118_s9 = sld [smem:[#allocation10]] }
  0x7e   : > { %v343_v36 = vmul.f32 %v342_v34, %v291_v6  ;;  %s626_s23 = sld [smem:[#allocation8 + $0x1]]  ;;  %v346_v41 = vstv %s1111_s14 }
  0x7f   : > { %v340_v38 = vadd.f32 %v339_v33, %v336_v29  ;;  %v349_v39 = vstv %s348_s16  ;;  %s627_s27 = sld [smem:[#allocation8 + $0x81]]  ;;  %v1124_v40 = vadd.f32 %v332_v32, %v330_v31 }
  0x80   : > { %v350_v42 = vmul.f32 %v349_v39, %v1120_v35  ;;  %v352_v43 = vstv %s622_s22  ;;  %s628_s29 = sld [smem:[#allocation8 + $0x101]] }
  0x81   : > { %v344_v44 = vadd.f32 %v343_v36, %v340_v38  ;;  %v353_v45 = vmul.f32 %v352_v43, %v1122_v37  ;;  %v356_v46 = vstv %s623_s8  ;;  %s629_s28 = sld [smem:[#allocation8 + $0x181]] }
  0x82   : > { %v357_v47 = vmul.f32 %v356_v46, %v1124_v40  ;;  %v360_v48 = vstv %s1115_s7  ;;  %s1131_s10 = sld [smem:[#allocation10 + $0x1]] }
  0x83   : > { %v1133_v49 = vadd.f32 %v346_v41, %v344_v44  ;;  %v354_v50 = vadd.f32 %v353_v45, %v350_v42  ;;  %s632_s12 = sld [smem:[#allocation8 + $0x2]]  ;;  %v364_v56 = vstv %s1118_s9 }
  0x84   : > { %v374_v51 = vstv %s626_s23  ;;  %s633_s11 = sld [smem:[#allocation8 + $0x82]]  ;;  %s607_s23 = sshll.u32 %s1097_s26, 2 }
  0x85   : > { %v358_v52 = vadd.f32 %v357_v47, %v354_v50  ;;  %v361_v53 = vmul.f32 %v360_v48, %v1133_v49  ;;  %v375_v54 = vmul.f32 %v374_v51, %v1120_v35  ;;  %v377_v55 = vstv %s627_s27  ;;  %s634_s13 = sld [smem:[#allocation8 + $0x102]]  ;;  %s645_s27 = sshll.u32 %s973_s25, 6 }
  0x86   : > { %v378_v57 = vmul.f32 %v377_v55, %v1122_v37  ;;  %v381_v58 = vstv %s628_s29  ;;  %s635_s15 = sld [smem:[#allocation8 + $0x182]]  ;;  %s288_s29 = scalar_lea.vmem [#allocation13], %s607_s23 }
  0x87   : > { %v362_v59 = vadd.f32 %v361_v53, %v358_v52  ;;  %v382_v60 = vmul.f32 %v381_v58, %v1124_v40  ;;  %v385_v61 = vstv %s629_s28  ;;  %s1140_s14 = sld [smem:[#allocation10 + $0x2]]  ;;  %s478_s28 = sshll.u32 %s288_s29, 4  ;;  %s479_s28 = int_to_ptr.vmem [resolvable:$true] %s478_s28 }
  0x88   : > { %v379_v62 = vadd.f32 %v378_v57, %v375_v54  ;;  %v386_v63 = vmul.f32 %v385_v61, %v1133_v49  ;;  %s638_s16 = sld [smem:[#allocation8 + $0x3]]  ;;  %v389_v6 = vstv %s1131_s10  ;;  %s918_s25 = smov [#allocation13]  }
  0x89   : > { %v365_v0 = vadd.f32 %v364_v56, %v362_v59  ;;  %v399_v1 = vstv %s632_s12  ;;  %s639_s22 = sld [smem:[#allocation8 + $0x83]] }
  0x8a   : > { %v383_v2 = vadd.f32 %v382_v60, %v379_v62  ;;  %v400_v3 = vmul.f32 %v399_v1, %v1120_v35  ;;  %v402_v4 = vstv %s633_s11  ;;  %s640_s8 = sld [smem:[#allocation8 + $0x103]]  ;;  %s1162_s11 = scalar_lea.hbm %s1204_s5, %s645_s27 }
  0x8b   : > { %v625_v5 = vmul.f32 -1.442695, %v365_v0  ;;  %v403_v7 = vmul.f32 %v402_v4, %v1122_v37  ;;  %v406_v8 = vstv %s634_s13  ;;  %s641_s7 = sld [smem:[#allocation8 + $0x183]]  ;;  %s465_s13 = scalar_lea.sflag [#allocation4], %s1097_s26 }
  0x8c   : > { %v387_v9 = vadd.f32 %v386_v63, %v383_v2  ;;  %v407_v10 = vmul.f32 %v406_v8, %v1124_v40  ;;  %v410_v11 = vstv %s635_s15  ;;  %s642_s9 = sld [smem:[#allocation10 + $0x3]]  ;;  %s831_s15 = scalar_lea.vmem %s479_s28, 64 }
  0x8d   : > { %v404_v12 = vadd.f32 %v403_v7, %v400_v3  ;;  %v411_v13 = vmul.f32 %v410_v11, %v1133_v49  ;;  %735 = vpow2.f32 %v625_v5  ;;  %v414_v20 = vstv %s1140_s14  ;;  %p832_p5 = scmp.ne.s32.totalorder %s479_s28, %s831_s15  ;;  %s835_s14 = sshll.u32 %s918_s25, 4  ;;  %s836_s14 = int_to_ptr.vmem [resolvable:$false] %s835_s14 }
  0x8e   : > { %v390_v14 = vadd.f32 %v389_v6, %v387_v9  ;;  %v424_v15 = vstv %s638_s16  ;;  %s837_s16 = scalar_lea.vmem %s836_s14, 128  ;;  %p838_p7 = scmp.lt.s32.totalorder %s479_s28, %s836_s14 }
  0x8f   : > { %v408_v16 = vadd.f32 %v407_v10, %v404_v12  ;;  %v425_v17 = vmul.f32 %v424_v15, %v1120_v35  ;;  %v427_v18 = vstv %s639_s22  ;;  %p833_p13 = pnand %p832_p5, %p1226_p10  ;;  %p839_p3 = scmp.lt.s32.totalorder %s837_s16, %s831_s15 }
  0x90   : > { %v631_v19 = vmul.f32 -1.442695, %v390_v14  ;;  %v428_v21 = vmul.f32 %v427_v18, %v1122_v37  ;;  %v431_v22 = vstv %s640_s8 }
  0x91   : > { %v412_v23 = vadd.f32 %v411_v13, %v408_v16  ;;  %v432_v24 = vmul.f32 %v431_v22, %v1124_v40  ;;  %v435_v25 = vstv %s641_s7  ;;  %p834_p2 = pneg %p833_p13  ;;  %p840_p1 = por %p839_p3, %p838_p7 }
  0x92   : > { %737 = vpow2.f32 %v631_v19  ;;  %v429_v26 = vadd.f32 %v428_v21, %v425_v17  ;;  %v436_v27 = vmul.f32 %v435_v25, %v1133_v49  ;;  %v439_v31 = vstv %s642_s9 }
  0x93   : > { %v415_v28 = vadd.f32 %v414_v20, %v412_v23  ;;  %p841_p12 = pnand %p840_p1, %p834_p2 }
  0x94   : > { %v433_v29 = vadd.f32 %v432_v24, %v429_v26 }
  0x95   : > { %v637_v30 = vmul.f32 -1.442695, %v415_v28 }
  0x96   : > { %v437_v32 = vadd.f32 %v436_v27, %v433_v29 }
  0x97   : > { %739 = vpow2.f32 %v637_v30 }
  0x98   : > { %v440_v33 = vadd.f32 %v439_v31, %v437_v32 }
  0x9a   : > { %v643_v34 = vmul.f32 -1.442695, %v440_v33  ;;  %v736_v36 = vpop.eup %735 }
  0x9b   : > { %v369_v39 = vadd.f32 1.0, %v736_v36 }
  0x9c   : > { %741 = vpow2.f32 %v643_v34 }
  0x9f   : > { %v738_v38 = vpop.eup %737 }
  0xa0   : > { %v394_v41 = vadd.f32 1.0, %v738_v38 }
  0xa2   : > { %743 = vrcp.f32 %v394_v41 }
  0xa3   : > { %745 = vrcp.f32 %v369_v39 }
  0xa4   : > { %v740_v42 = vpop.eup %739 }
  0xa5   : > { %v419_v43 = vadd.f32 1.0, %v740_v42 }
  0xa7   : > { %747 = vrcp.f32 %v419_v43 }
  0xa9   : > { %v742_v44 = vpop.eup %741 }
  0xaa   : > { %v444_v45 = vadd.f32 1.0, %v742_v44 }
  0xac   : > { %749 = vrcp.f32 %v444_v45 }
  0xaf   : > { %v744_v46 = vpop.eup %743 }
  0xb0   : > { %v397_v47 = vmul.f32 %v744_v46, %v1122_v37  ;;  %v746_v48 = vpop.eup %745 }
  0xb1   : > { %v372_v51 = vmul.f32 %v746_v48, %v1120_v35 }
  0xb2   : > { %v449_v52 = vrot.slane %v397_v47, 7 }
  0xb4   : > { %v748_v50 = vpop.eup %747  ;;  %v458_v55 = vsel %vm457_vm0, %v372_v51, %v449_v52 }
  0xb5   : > { %v422_v53 = vmul.f32 %v748_v50, %v1124_v40 }
  0xb7   : > { %v452_v54 = vrot.slane %v422_v53, 6 }
  0xb9   : > { %v750_v56 = vpop.eup %749  ;;  %v460_v37 = vsel %vm459_vm1, %v458_v55, %v452_v54 }
  0xba   : > { %v447_v57 = vmul.f32 %v750_v56, %v1133_v49 }
  0xbc   : > { %v455_v58 = vrot.slane %v447_v57, 5 }
  0xbe   : > { %v462_v35 = vsel %vm461_vm2, %v460_v37, %v455_v58 }
  0xbf   : > { %463 = vst [vmem:[%s288_s29] sm:$0xf] %v462_v35 }
  0xc0   : > { %844 = shalt.err (!%p841_p12)
}
  0xc1   : > { %s845_s22 = scalar_lea.hbm %s1162_s11, 64  ;;  %s849_s7 = scalar_lea.hbm %s1204_s5, 128 }
  0xc2   : > { %p846_p0 = scmp.ne.s32.totalorder %s1162_s11, %s845_s22  ;;  %p850_p11 = scmp.lt.s32.totalorder %s1162_s11, %s1204_s5 }
  0xc3   : > { %p851_p8 = scmp.lt.s32.totalorder %s849_s7, %s845_s22 }
  0xc4   : > { %p847_p4 = pnand %p846_p0, %p1226_p10 }
  0xc5   : > { %p852_p9 = por %p851_p8, %p850_p11 }
  0xc6   : > { %p848_p6 = pneg %p847_p4 }
  0xc8   : > { %p853_p5 = pnand %p852_p9, %p848_p6 }
  0xca   : > { %856 = shalt.err (!%p853_p5)
}
  0xcb   : > { %666 = dma.vmem_to_hbm [thread:$0]  (%p1226_p10), %s479_s28, 64, %s1162_s11, %s465_s13  }
  0xcc PF: > { %s490_s27 = sand.u32 1, %s899_s18   ;;  %p1227_p13 = scmp.ne.s32.totalorder %s1214_s6, 0 }
  0xcd   : > { %p1228_p2 = scmp.ge.s32.totalorder %s911_s21, 2  ;;  %s491_s29 = scalar_lea.sflag [#allocation4], %s490_s27 }
  0xcf   : > { %p686_p7 = pnand %p1228_p2, %p1227_p13 }
  0xd1   : > { %p687_p3 = pneg %p686_p7 }
  0xd3   : > { %894 = dma.done.wait (%p687_p3), %s491_s29, 64  }
  0xd4   : > { %896 = vsyncadd (%p687_p3), %s491_s29, 4294967232  ;;  %p22_p1 = scmp.ge.s32.totalorder %s1018_s17, 4   ;;  %s1229_s18 = smov %s903_s19 }
  0xd5   : > { %s1230_s19 = smov %s907_s20  ;;  %s1231_s20 = smov %s1029_s24 }
  0xd6   : > { %s1232_s21 = smov %s1018_s17  ;;  %24 = sbr.rel (!%p22_p1) target bundleno = 9 (0x9), region = 103 }
  0xdb   :  { %496 = vsyncpa [#allocation3], 1 }
  0xdc   :  { %498 = vsyncpa [#allocation3 + $0x1], 1 }
  0xdd   :  { %499 = vsyncpa [#allocation4], 1 }
  0xde   :  { %501 = vsyncpa [#allocation4 + $0x1], 1 }
  0xdf   :  { %502 = vsyncpa [#allocation5], 1 }
  0xe0   :  { %504 = vsyncpa [#allocation5 + $0x1], 1 }
  0xe1   :  { %505 = vsyncpa [#allocation9], 1 }
  0xe2   :  { %506 = vsyncpa [#allocation6], 1 }
  0xe3   :  { %508 = vsyncpa [#allocation6 + $0x1], 1 }
  0xe4   :  { %509 = vsyncpa [#allocation11], 1 }

</bundles_post_ra>
